<compile_context>
chip_gen: v5e
topology: v5e:2x2
jax: 0.10.0
libtpu: 0.0.40
codegen_flags: <defaults>
</compile_context>

<pallas_src>
import functools

import jax
import jax.numpy as jnp
from jax.experimental import pallas as pl
from jax.experimental.pallas import tpu as pltpu

EPS = 1e-5
_VMEM_LIMIT = 32 * 1024 * 1024


# ---------------------------------------------------------------------------
# Pass 1: per-tile statistics (column sums + Gram matrix), written per tile.
# ---------------------------------------------------------------------------
def stats_kernel(x_ref, colsum_ref, gram_ref, *, hw, thw, needs_mask):
    # x_ref:      (C, THW) f32   one (batch, spatial-tile) block
    # colsum_ref: (C, 1)   f32   per-tile partial sum over spatial positions
    # gram_ref:   (C, C)   f32   per-tile partial Gram  x_tile @ x_tile^T
    x = x_ref[...]
    if needs_mask:
        # Last spatial tile may extend past H*W: the padded region holds
        # unspecified data, so zero it (jnp.where, not multiply: NaN-safe).
        j = pl.program_id(1)
        valid = hw - j * thw                      # >= thw for all but last tile
        col = jax.lax.broadcasted_iota(jnp.int32, (1, thw), 1)
        x = jnp.where(col < valid, x, 0.0)

    colsum_ref[...] = jnp.sum(x, axis=1, keepdims=True)       # f32, (C, 1)

    xb = x.astype(jnp.bfloat16)                  # bf16 MXU operands, f32 acc
    gram_ref[...] = jax.lax.dot_general(
        xb, xb,
        dimension_numbers=(((1,), (1,)), ((), ())),            # x @ x^T
        preferred_element_type=jnp.float32)


# ---------------------------------------------------------------------------
# Pass 2: apply folded conv+BN:  out = w_eff @ x + b_eff   (per block)
# ---------------------------------------------------------------------------
def apply_kernel(x_ref, w_ref, b_ref, o_ref):
    # x_ref: (Cin, THW) f32;  w_ref: (Cout, Cin) bf16;  b_ref: (Cout, 1) f32
    # o_ref: (Cout, THW) f32
    xb = x_ref[...].astype(jnp.bfloat16)
    y = jax.lax.dot_general(
        w_ref[...], xb,
        dimension_numbers=(((1,), (0,)), ((), ())),
        preferred_element_type=jnp.float32)
    o_ref[...] = y + b_ref[...]
    # Any garbage in a ragged tail stays column-local and is not written back.


# ---------------------------------------------------------------------------
# Fold BN batch statistics into the conv weight / bias (tiny, plain JAX)
# ---------------------------------------------------------------------------
def _fold_bn_from_stats(sum_x, G, weight, gamma, beta, m_rows):
    """sum_x: (Cin,), G: (Cin,Cin), weight: (Cout,Cin) f32. Returns folded
    w_app (Cout,Cin), b_eff (Cout,), plus mean_y / biased var for stats."""
    hi = jax.lax.Precision.HIGHEST
    w_mat = weight.T                                            # (Cin, Cout)
    mean_y = jnp.dot(sum_x, w_mat, precision=hi) / m_rows       # (Cout,)
    ey2 = jnp.sum(w_mat * jnp.dot(G, w_mat, precision=hi), axis=0) / m_rows
    var_b = jnp.maximum(ey2 - mean_y * mean_y, 0.0)             # biased var
    scale = gamma * jax.lax.rsqrt(var_b + EPS)
    w_app = weight * scale[:, None]                             # (Cout, Cin)
    b_eff = beta - mean_y * scale
    return w_app, b_eff, mean_y, var_b


def _pick_tile_hw(hw, target):
    """Spatial tile length: multiple of 128, <= hw, preferring an exact
    divisor of hw (no ragged tail / no masking) near the target size."""
    target = max(128, min(int(target), 1 << 20))
    if hw <= 128:
        return hw                                   # single full-dim block
    best = 0
    for cand in range(128, min(2 * target, hw) + 1, 128):
        if hw % cand == 0:
            best = cand
    if best >= target // 2:
        return best
    return max(128, min(target, (hw // 128) * 128))  # ragged tail, masked


# ---------------------------------------------------------------------------
# Wrapper: NCHW in -> stats pass -> fold -> apply pass -> NCHW out
# ---------------------------------------------------------------------------
def conv2d_1x1_batchnorm(x_nchw, weight, gamma, beta, *, tile_hw=4096,
                         running_mean=None, running_var=None, momentum=0.1):
    """x_nchw: (N, Cin, H, W) f32; weight: (Cout, Cin[,1,1]); gamma/beta: (Cout,).
    Returns (N, Cout, H, W) f32.  If running_mean/var are given, also returns
    the PyTorch-style updated running statistics (functional, not in-place)."""
    if weight.ndim == 4:
        weight = weight.reshape(weight.shape[0], weight.shape[1])
    N, C_in, H, W = x_nchw.shape
    C_out = weight.shape[0]
    assert weight.shape[1] == C_in
    HW = H * W
    M = N * HW

    x3 = x_nchw.reshape(N, C_in, HW).astype(jnp.float32)   # free reshape, no copy

    thw = _pick_tile_hw(HW, tile_hw)
    T = pl.cdiv(HW, thw)
    needs_mask = (HW % thw) != 0
    grid = (N, T)
    cparams = pltpu.CompilerParams(
        dimension_semantics=("parallel", "parallel"),
        vmem_limit_bytes=_VMEM_LIMIT)

    # ---- pass 1: per-tile column sums and Gram partials ----
    colsum_p, gram_p = pl.pallas_call(
        functools.partial(stats_kernel, hw=HW, thw=thw, needs_mask=needs_mask),
        out_shape=(jax.ShapeDtypeStruct((N, T, C_in, 1), jnp.float32),
                   jax.ShapeDtypeStruct((N, T, C_in, C_in), jnp.float32)),
        grid=grid,
        in_specs=[pl.BlockSpec((None, C_in, thw), lambda n, j: (n, 0, j))],
        out_specs=(pl.BlockSpec((None, None, C_in, 1), lambda n, j: (n, j, 0, 0)),
                   pl.BlockSpec((None, None, C_in, C_in), lambda n, j: (n, j, 0, 0))),
        compiler_params=cparams,
    )(x3)

    # ---- fold BN batch stats into the conv weight / bias (tiny) ----
    sum_x = jnp.sum(colsum_p, axis=(0, 1))[:, 0]            # (Cin,)
    G = jnp.sum(gram_p, axis=(0, 1))                          # (Cin, Cin)
    w_f32 = weight.astype(jnp.float32)
    w_app_f32, b_eff, mean_y, var_b = _fold_bn_from_stats(
        sum_x, G, w_f32, gamma.astype(jnp.float32), beta.astype(jnp.float32), M)
    w_app = w_app_f32.astype(jnp.bfloat16)                    # (Cout, Cin)
    b_app = b_eff.reshape(C_out, 1).astype(jnp.float32)

    # ---- pass 2: out = w_eff @ x + b_eff, written straight to NCHW ----
    out3 = pl.pallas_call(
        apply_kernel,
        out_shape=jax.ShapeDtypeStruct((N, C_out, HW), jnp.float32),
        grid=grid,
        in_specs=[pl.BlockSpec((None, C_in, thw), lambda n, j: (n, 0, j)),
                  pl.BlockSpec((C_out, C_in), lambda n, j: (0, 0)),
                  pl.BlockSpec((C_out, 1), lambda n, j: (0, 0))],
        out_specs=pl.BlockSpec((None, C_out, thw), lambda n, j: (n, 0, j)),
        compiler_params=cparams,
    )(x3, w_app, b_app)

    out = out3.reshape(N, C_out, H, W)

    if running_mean is not None and running_var is not None:
        var_unbiased = var_b * (M / max(M - 1, 1))
        new_rm = (1.0 - momentum) * running_mean + momentum * mean_y
        new_rv = (1.0 - momentum) * running_var + momentum * var_unbiased
        return out, new_rm, new_rv
    return out


# ---------------------------------------------------------------------------
# References
# ---------------------------------------------------------------------------
def reference_f32(x_nchw, weight, gamma, beta):
    """Pure-f32 PyTorch-semantics reference (training-mode BN)."""
    N, C_in, H, W = x_nchw.shape
    C_out = weight.shape[0]
    xf = jnp.transpose(x_nchw, (0, 2, 3, 1)).reshape(-1, C_in)
    y = jnp.dot(xf, weight.T, precision=jax.lax.Precision.HIGHEST)
    mean = jnp.mean(y, axis=0, keepdims=True)
    var = jnp.mean((y - mean) ** 2, axis=0, keepdims=True)
    out = (y - mean) * jax.lax.rsqrt(var + EPS) * gamma[None, :] + beta[None, :]
    return jnp.transpose(out.reshape(N, H, W, C_out), (0, 3, 1, 2))


def matched_reference(x_nchw, weight, gamma, beta):
    """Reference mirroring the kernel's precision choices exactly (f32 column
    sums, bf16 Gram with f32 accumulation, bf16 folded weight + bf16 x in the
    apply matmul) -> tight check of the Pallas tiling / masking / fold logic."""
    N, C_in, H, W = x_nchw.shape
    C_out = weight.shape[0]
    M = N * H * W
    hi = jax.lax.Precision.HIGHEST
    xf = jnp.transpose(x_nchw, (0, 2, 3, 1)).reshape(M, C_in).astype(jnp.float32)
    xb = xf.astype(jnp.bfloat16).astype(jnp.float32)
    sum_x = jnp.sum(xf, axis=0)
    G = jnp.dot(xb.T, xb, precision=hi)
    w_f32 = weight.astype(jnp.float32)
    w_app, b_eff, _, _ = _fold_bn_from_stats(sum_x, G, w_f32, gamma, beta, M)
    w_app_b = w_app.astype(jnp.bfloat16).astype(jnp.float32)
    y = jnp.dot(xb, w_app_b.T, precision=hi) + b_eff[None, :]
    return jnp.transpose(y.reshape(N, H, W, C_out), (0, 3, 1, 2))


if __name__ == "__main__":
    # Channels fixed at 32 by the module; small spatial 14x14 (HW=196) also
    # exercises the ragged-tail masked path (196 is not a multiple of 128).
    N, C, H, W = 2, 32, 14, 14

    key = jax.random.PRNGKey(0)
    kx, kw, kg, kb, kx2 = jax.random.split(key, 5)

    x = jax.random.normal(kx, (N, C, H, W), dtype=jnp.float32)
    conv_w = jax.random.normal(kw, (C, C, 1, 1), dtype=jnp.float32) * 0.1
    gamma = 1.0 + 0.1 * jax.random.normal(kg, (C,), dtype=jnp.float32)
    beta = 0.1 * jax.random.normal(kb, (C,), dtype=jnp.float32)

    out = conv2d_1x1_batchnorm(x, conv_w, gamma, beta)
    out = jax.block_until_ready(out)
    assert out.shape == (N, C, H, W)
    assert out.dtype == jnp.float32

    w2 = conv_w.reshape(C, C)
    ref_exact = matched_reference(x, w2, gamma, beta)
    ref_f32 = reference_f32(x, w2, gamma, beta)
    # tight check vs the precision-matched reference (validates kernel logic)
    assert jnp.allclose(out, ref_exact, atol=1e-3, rtol=1e-3), \
        float(jnp.max(jnp.abs(out - ref_exact)))
    # looser check vs the pure-f32 PyTorch-semantics reference (bf16 matmuls)
    assert jnp.allclose(out, ref_f32, atol=3e-2, rtol=3e-2), \
        float(jnp.max(jnp.abs(out - ref_f32)))

    # Second config: N=1 (the real module's batch), HW a multiple of 128 ->
    # exercises the exact-divisor (unmasked) tiling path.
    x2 = jax.random.normal(kx2, (1, C, 16, 16), dtype=jnp.float32)
    out2 = jax.block_until_ready(conv2d_1x1_batchnorm(x2, conv_w, gamma, beta))
    ref2 = reference_f32(x2, w2, gamma, beta)
    assert jnp.allclose(out2, ref2, atol=3e-2, rtol=3e-2), \
        float(jnp.max(jnp.abs(out2 - ref2)))

    # Functional running-stats update (PyTorch BN training-mode side effect).
    out3, new_rm, new_rv = conv2d_1x1_batchnorm(
        x, conv_w, gamma, beta,
        running_mean=jnp.zeros((C,), jnp.float32),
        running_var=jnp.ones((C,), jnp.float32))
    jax.block_until_ready((out3, new_rm, new_rv))
    assert new_rm.shape == (C,) and new_rv.shape == (C,)

    print("KERNEL_OK")
</pallas_src>

<mosaic_0001>
module attributes {stable_mosaic.version = 11 : i64} {
  func.func @stats_kernel(%arg0: i32, %arg1: i32, %arg2: memref<1x32x128xf32, #tpu.memory_space<vmem>>, %arg3: memref<1x1x32x1xf32, #tpu.memory_space<vmem>>, %arg4: memref<1x1x32x32xf32, #tpu.memory_space<vmem>>) attributes {dimension_semantics = [#tpu.dimension_semantics<parallel>, #tpu.dimension_semantics<parallel>], iteration_bounds = array<i64: 2, 2>, scalar_prefetch = 0 : i64, scratch_operands = 0 : i64, tpu.core_type = #tpu.core_type<tc>, window_params = [{transform_indices = @transform_0, window_bounds = array<i64: 1, 32, 128>}, {transform_indices = @transform_1, window_bounds = array<i64: 1, 1, 32, 1>}, {transform_indices = @transform_2, window_bounds = array<i64: 1, 1, 32, 32>}]} {
    %c0 = arith.constant 0 : index
    %c0_0 = arith.constant 0 : index
    %c0_1 = arith.constant 0 : index
    %0 = vector.load %arg2[%c0, %c0_0, %c0_1] : memref<1x32x128xf32, #tpu.memory_space<vmem>>, vector<1x32x128xf32>
    %1 = vector.shape_cast %0 : vector<1x32x128xf32> to vector<32x128xf32>
    %c128_i32 = arith.constant 128 : i32
    %2 = arith.muli %arg1, %c128_i32 : i32
    %c196_i32 = arith.constant 196 : i32
    %3 = arith.subi %c196_i32, %2 : i32
    %4 = tpu.iota {dimensions = array<i32: 1>} : vector<1x128xi32>
    %5 = vector.broadcast %3 : i32 to vector<1x128xi32>
    %6 = arith.cmpi slt, %4, %5 : vector<1x128xi32>
    %cst = arith.constant 0.000000e+00 : f32
    %7 = vector.shape_cast %6 : vector<1x128xi1> to vector<1x128xi1>
    %8 = vector.broadcast %7 : vector<1x128xi1> to vector<32x128xi1>
    %9 = vector.broadcast %cst : f32 to vector<32x128xf32>
    %10 = arith.select %8, %1, %9 : vector<32x128xi1>, vector<32x128xf32>
    %cst_2 = arith.constant dense<0.000000e+00> : vector<32xf32>
    %11 = vector.multi_reduction <add>, %10, %cst_2 [1] : vector<32x128xf32> to vector<32xf32>
    %12 = vector.shape_cast %11 : vector<32xf32> to vector<32x1xf32>
    %c0_3 = arith.constant 0 : index
    %c0_4 = arith.constant 0 : index
    %c0_5 = arith.constant 0 : index
    %c0_6 = arith.constant 0 : index
    %13 = vector.load %arg3[%c0_3, %c0_4, %c0_5, %c0_6] : memref<1x1x32x1xf32, #tpu.memory_space<vmem>>, vector<1x1x32x1xf32>
    %14 = vector.shape_cast %13 : vector<1x1x32x1xf32> to vector<32x1xf32>
    %15 = vector.shape_cast %12 : vector<32x1xf32> to vector<1x1x32x1xf32>
    tpu.vector_store %arg3[%c0_3, %c0_4, %c0_5, %c0_6], %15 {strides = array<i32>} : memref<1x1x32x1xf32, #tpu.memory_space<vmem>>, vector<1x1x32x1xf32>,
    %16 = arith.truncf %10 : vector<32x128xf32> to vector<32x128xbf16>
    %cst_7 = arith.constant dense<0.000000e+00> : vector<32x32xf32>
    %17 = tpu.matmul %16, %16, %cst_7 {dimension_numbers = #tpu.dot_dimension_numbers<[1], [1], [0], [0], [0, 0, 1, 0], [], []>} : vector<32x128xbf16>, vector<32x128xbf16>, vector<32x32xf32> -> vector<32x32xf32>
    %c0_8 = arith.constant 0 : index
    %c0_9 = arith.constant 0 : index
    %c0_10 = arith.constant 0 : index
    %c0_11 = arith.constant 0 : index
    %18 = vector.load %arg4[%c0_8, %c0_9, %c0_10, %c0_11] : memref<1x1x32x32xf32, #tpu.memory_space<vmem>>, vector<1x1x32x32xf32>
    %19 = vector.shape_cast %18 : vector<1x1x32x32xf32> to vector<32x32xf32>
    %20 = vector.shape_cast %17 : vector<32x32xf32> to vector<1x1x32x32xf32>
    tpu.vector_store %arg4[%c0_8, %c0_9, %c0_10, %c0_11], %20 {strides = array<i32>} : memref<1x1x32x32xf32, #tpu.memory_space<vmem>>, vector<1x1x32x32xf32>,
    return
  }
  func.func @transform_0(%arg0: i32, %arg1: i32) -> (i32, i32, i32) {
    %c0_i32 = arith.constant 0 : i32
    %c0_i32_0 = arith.constant 0 : i32
    return %arg0, %c0_i32, %arg1 : i32, i32, i32
  }
  func.func @transform_1(%arg0: i32, %arg1: i32) -> (i32, i32, i32, i32) {
    %c0_i32 = arith.constant 0 : i32
    %c0_i32_0 = arith.constant 0 : i32
    %c0_i32_1 = arith.constant 0 : i32
    return %arg0, %arg1, %c0_i32, %c0_i32_0 : i32, i32, i32, i32
  }
  func.func @transform_2(%arg0: i32, %arg1: i32) -> (i32, i32, i32, i32) {
    %c0_i32 = arith.constant 0 : i32
    %c0_i32_0 = arith.constant 0 : i32
    %c0_i32_1 = arith.constant 0 : i32
    return %arg0, %arg1, %c0_i32, %c0_i32_0 : i32, i32, i32, i32
  }
}

</mosaic_0001>

<bundles_post_ra>
// kernel: tpu_custom_call.1
= control target key start
LH: loop header
LB: loop body
LE: loop exit
PB: predicated region body
PF: predicated region fallthrough
CT: control target
= control target key end

     0   :  { %8 = vsyncpa [#allocation3], 0  ;;  %s872_s0 = inlined_call_operand.hbm [shape: f32[2,32,196], index: 0, kind: input, shape index: {}]   ;;  %s873_s1 = inlined_call_operand.vmem [shape: f32[2,2,32,1], index: 1, kind: output, shape index: {0}]   ;;  %s874_s2 = inlined_call_operand.hbm [shape: f32[2,2,32,32], index: 2, kind: output, shape index: {1}]  }
   0x1   :  { %10 = vsyncpa [#allocation3 + $0x1], 0 }
   0x2   :  { %11 = vsyncpa [#allocation4], 0 }
   0x3   :  { %13 = vsyncpa [#allocation4 + $0x1], 0  ;;  %s687_s9 = smov 0   ;;  %s689_s10 = smov 0  }
   0x4   :  { %s691_s11 = smov 0   ;;  %s693_s12 = smov 0  }
   0x5   :  { %s695_s13 = smov 0   ;;  %s697_s14 = smov 0  }
   0x6   :  { %s699_s15 = smov 0   ;;  %s701_s16 = smov 0  }
   0x7 LB: > { %s420_s17 = sadd.s32 4294967295, %s665_s16   ;;  %s421_s18 = sadd.s32 4294967294, %s665_s16   ;;  %s665_s16 = sphi %s701_s16, %s19_s16   ;;  %s661_s15 = sphi %s699_s15, %s895_s15   ;;  %s657_s14 = sphi %s697_s14, %s894_s14   ;;  %s653_s13 = sphi %s695_s13, %s893_s13   ;;  %s649_s12 = sphi %s693_s12, %s892_s12   ;;  %s645_s11 = sphi %s691_s11, %s891_s11   ;;  %s641_s10 = sphi %s689_s10, %s890_s10   ;;  %s637_s9 = sphi %s687_s9, %s889_s9  }
   0x8   : > { %s28_s19 = sadd.s32 1, %s657_s14  ;;  %s31_s20 = sadd.s32 1, %s661_s15 }
   0x9   : > { %p29_p0 = scmp.ge.s32.totalorder %s28_s19, 2  ;;  %s40_s21 = sadd.s32 1, %s645_s11 }
   0xa   : > { %p47_p1 = scmp.ne.s32.totalorder %s645_s11, %s641_s10  ;;  %p48_p2 = scmp.eq.s32.totalorder %s665_s16, 0 }
   0xb   : > { %s897_s19 = smov (%p29_p0, %s28_s19), 0  ;;  %s899_s20 = smov (!%p29_p0, %s31_s20), %s661_s15 }
   0xc   : > { %877 = sst [smem:[#allocation8_spill]] %s897_s19  ;;  %s36_s22 = ssub.s32 %s657_s14, %s897_s19 }
   0xd   : > { %p740_p3 = por %p48_p2, %p47_p1  ;;  %p33_p4 = scmp.ge.s32.totalorder %s899_s20, 2 }
   0xe   : > { %p53_p5 = scmp.ne.s32.totalorder %s641_s10, %s637_s9  ;;  %p54_p6 = scmp.eq.s32.totalorder %s420_s17, 0 }
   0xf   : > { %p107_p7 = scmp.eq.s32.totalorder %s420_s17, 3  ;;  %s901_s20 = smov (%p33_p4, %s899_s20), 0 }
  0x10   : > { %879 = sst [smem:[#allocation9_spill]] %s901_s20  ;;  %p748_p8 = por %p54_p6, %p53_p5 }
  0x11   : > { %p752_p9 = por %p107_p7, %p47_p1  ;;  %s35_s26 = ssub.s32 %s661_s15, %s901_s20 }
  0x12   : > { %p113_p10 = scmp.eq.s32.totalorder %s421_s18, 3  ;;  %s37_s27 = sor.u32 %s36_s22, %s35_s26 }
  0x13   : > { %p38_p11 = scmp.eq.s32.totalorder %s37_s27, 0  ;;  %p466_p13 = scmp.lt.s32.totalorder %s665_s16, 4 }
  0x14   : > { %p758_p12 = por %p113_p10, %p53_p5  ;;  %s133_s29 = sand.u32 1, %s645_s11  }
  0x15   : > { %s765_s30 = scalar_select %p38_p11, %s645_s11, %s40_s21  }
  0x16   : > { %s424_s3 = sshll.u32 %s133_s29, 5  ;;  %s425_s4 = sshll.u32 %s661_s15, 3 }
  0x17   : > { %s141_s5 = sadd.s32 %s657_s14, %s425_s4  ;;  %s137_s6 = scalar_lea.vmem [#allocation2], %s424_s3 }
  0x18   : > { %s146_s7 = sshll.u32 %s137_s6, 4  ;;  %s426_s8 = sshll.u32 %s141_s5, 3  ;;  %s147_s7 = int_to_ptr.vmem [resolvable:$true] %s146_s7 }
  0x19   : > { %s143_s22 = scalar_lea.hbm %s872_s0, %s426_s8  ;;  %p459_p0 = pnand %p466_p13, %p740_p3 }
  0x1a   : > { %s144_s26 = sshll.u32 %s143_s22, 4  ;;  %s134_s27 = scalar_lea.sflag [#allocation3], %s133_s29  ;;  %s145_s26 = int_to_ptr.hbm [resolvable:$true] %s144_s26 }
  0x1b   : > { %s667_s21 = smov 256   ;;  %s668_s20 = smov 128  }
  0x1c   : > { %s669_s19 = smov 8   ;;  %p427_p1 = scmp.ge.s32.totalorder %s665_s16, 1 }
  0x1d   : > { %461 = dma.hbm_to_vmem [thread:$0]  (!%p459_p0), %s145_s26, 512, %s147_s7, %s134_s27, %s667_s21, %s668_s20, %s669_s19  }
  0x1e   : > { %p154_p2 = scmp.lt.s32.totalorder %s665_s16, 5 }
  0x20   : > { %p155_p4 = pnand %p427_p1, %p154_p2 }
  0x21   : > { %s777_s3 = sand.u32 (!%p155_p4), 1, %s641_s10  }
  0x22   : > { %158 = sbr.rel (%p155_p4) target bundleno = 201 (0xc9), region = 24  ;;  %s428_s23 = sshll.u32 (!%p155_p4), %s777_s3, 5 }
  0x23   : > { %s161_s4 = scalar_lea.sflag (!%p155_p4), [#allocation3], %s777_s3  ;;  %s164_s5 = scalar_lea.vmem (!%p155_p4), [#allocation2], %s428_s23 }
  0x27   : > { %628 = dma.done.wait (%p748_p8), %s161_s4, 512  }
  0x28   : > { %630 = vsyncadd (%p748_p8), %s161_s4, 4294966784  ;;  %s433_s19 = sshll.u32 %s649_s12, 7  ;;  %v211_v0 = vlaneseq  ;;  %v207_v5 = vld [vmem:[%s164_s5 + $0x10] sm:$0xff]  ;;  %v208_v6 = vld [vmem:[%s164_s5 + $0x18] sm:$0xff]  ;;  %p195_p3 = scmp.lt.s32.totalorder %s653_s13, 1  ;;  %vm229_vm2 = vcmask 7168  }
  0x29   : > { %s210_s20 = ssub.s32 196, %s433_s19  ;;  %v205_v7 = vld [vmem:[%s164_s5] sm:$0xff]  ;;  %v435_v8 = vpack.c.bf16 %v208_v6, %v207_v5  ;;  %v206_v11 = vld [vmem:[%s164_s5 + $0x8] sm:$0xff]  ;;  %p197_p5 = scmp.lt.s32.totalorder %s649_s12, 1  ;;  %vm255_vm3 = vcmask 261120  }
  0x2a   : > { %v212_v1 = vand.u32 127, %v211_v0  ;;  %v213_v2 = vstv %s210_s20  ;;  %v438_v12 = vpack.c.bf16 %v206_v11, %v205_v7  ;;  %s196_s24 = scalar_select %p195_p3, %s653_s13, 1 }
  0x2b   : > { %s198_s29 = scalar_select %p197_p5, %s649_s12, 1 }
  0x2c   : > { %vm788_vm0 = vcmp.lt.s32.totalorder %v212_v1, %v213_v2  ;;  %s431_s7 = sshll.u32 %s196_s24, 3  ;;  %s447_s27 = sshll.u32 %s649_s12, 2 }
  0x2d   : > { %vm795_vm1 = vmpackc.low %vm788_vm0, %vm788_vm0  ;;  %v219_v9 = vsel %vm788_vm0, %v207_v5, 0.0  ;;  %v217_v10 = vsel %vm788_vm0, %v205_v7, 0.0  ;;  %v220_v13 = vsel %vm788_vm0, %v208_v6, 0.0  ;;  %v218_v14 = vsel %vm788_vm0, %v206_v11, 0.0  ;;  %s430_s6 = sshll.u32 %s198_s29, 2  ;;  %s448_s21 = sshll.u32 %s653_s13, 3 }
  0x2e   : > { %225 = vadd.xlane.f32.xlu1 %v219_v9  ;;  %221 = vadd.xlane.f32.xlu0 %v217_v10  ;;  %s201_s8 = sadd.s32 %s431_s7, %s430_s6  ;;  %s284_s4 = sadd.s32 %s448_s21, %s447_s27 }
  0x2f   : > { %436 = vmatpush.bf16.xpose.msk.msra.mxu0 %vm795_vm1, %v435_v8  ;;  %452 = vmatpush.bf16.xpose.msk.msra.mxu1 %vm795_vm1, %v435_v8  ;;  %s432_s17 = sshll.u32 %s201_s8, 3  ;;  %s449_s5 = sshll.u32 %s284_s4, 3 }
  0x30   : > { %s203_s26 = scalar_lea.vmem %s873_s1, %s432_s17  ;;  %s194_s19 = scalar_lea.vmem [#allocation5], %s428_s23 }
  0x31   : > { %s286_s29 = scalar_lea.hbm %s874_s2, %s449_s5  ;;  %s287_s6 = sshll.u32 %s194_s19, 4  ;;  %s288_s6 = int_to_ptr.vmem [resolvable:$true] %s287_s6 }
  0x32   : > { %s289_s7 = sshll.u32 %s286_s29, 4  ;;  %s270_s12 = scalar_lea.sflag [#allocation4], %s777_s3  ;;  %s290_s7 = int_to_ptr.hbm [resolvable:$true] %s289_s7 }
  0x33   : > { %s581_s13 = sshra.s32 %s290_s7, 4  ;;  %s587_s18 = scalar_lea.hbm %s874_s2, 128  ;;  %s582_s13 = int_to_ptr.hbm [resolvable:$true] %s581_s13 }
  0x34   : > { %s583_s8 = scalar_lea.hbm %s582_s13, 32  ;;  %p588_p10 = scmp.lt.s32.totalorder %s582_s13, %s874_s2 }
  0x35   : > { %p584_p6 = scmp.ne.s32.totalorder %s582_s13, %s583_s8  ;;  %p589_p11 = scmp.lt.s32.totalorder %s587_s18, %s583_s8 }
  0x36   : > { %227 = vadd.xlane.f32.xlu1 %v220_v13  ;;  %223 = vadd.xlane.f32.xlu0 %v218_v14 }
  0x37   : > { %439 = vmatpush.bf16.xpose.msk.msra.mxu0 %vm795_vm1, %v438_v12  ;;  %453 = vmatpush.bf16.xpose.msk.msra.mxu1 %vm795_vm1, %v438_v12  ;;  %p585_p7 = pnand %p584_p6, %p752_p9  ;;  %p590_p13 = por %p589_p11, %p588_p10 }
  0x39   : > { %p586_p8 = pneg %p585_p7 }
  0x3b   : > { %p591_p0 = pnand %p590_p13, %p586_p8 }
  0x3e   : > { %442 = vmatmul.msk.bf16.vlgmr.msra.gmra.mxu0 %vm795_vm1, %v438_v12  ;;  %445 = vmatmul.msk.bf16.vlgmr.msra.gmra.mxu1 %vm795_vm1, %v435_v8 }
  0xa1   : > { %v226_v15 = vpop.xlane.xlu1 %225  ;;  %v222_v16 = vpop.xlane.xlu0 %221 }
  0xa2   : > { %232 = vst.msk [vmem:[%s203_s26 + $0x10] sm:$0xff] %vm229_vm2, %v226_v15 }
  0xa3   : > { %230 = vst.msk [vmem:[%s203_s26] sm:$0xff] %vm229_vm2, %v222_v16 }
  0xa9   : > { %v228_v17 = vpop.xlane.xlu1 %227  ;;  %v224_v18 = vpop.xlane.xlu0 %223 }
  0xaa   : > { %233 = vst.msk [vmem:[%s203_s26 + $0x18] sm:$0xff] %vm229_vm2, %v228_v17 }
  0xab   : > { %231 = vst.msk [vmem:[%s203_s26 + $0x8] sm:$0xff] %vm229_vm2, %v224_v18 }
  0xbb   : > { %v245_v19 = vpop.f32.mrf.mxu0  ;;  %v250_v20 = vpop.f32.mrf.mxu1 }
  0xbc   : > { %256 = vst.msk [vmem:[%s194_s19] sm:$0xff] %vm255_vm3, %v245_v19 }
  0xbd   : > { %258 = vst.msk [vmem:[%s194_s19 + $0x10] sm:$0xff] %vm255_vm3, %v250_v20 }
  0xc3   : > { %v247_v21 = vpop.f32.mrf.mxu0  ;;  %v252_v22 = vpop.f32.mrf.mxu1 }
  0xc4   : > { %257 = vst.msk [vmem:[%s194_s19 + $0x8] sm:$0xff] %vm255_vm3, %v247_v21 }
  0xc5   : > { %259 = vst.msk [vmem:[%s194_s19 + $0x18] sm:$0xff] %vm255_vm3, %v252_v22 }
  0xc6   : > { %594 = shalt.err (!%p591_p0)
}
  0xc7   : > { %s670_s3 = smov 128   ;;  %s671_s27 = smov 8  }
  0xc8   : > { %456 = dma.vmem_to_hbm [thread:$0]  (%p752_p9), %s288_s6, 512, %s290_s7, %s270_s12, %s670_s3, %s670_s3, %s671_s27  }
  0xc9 PF: > { %p467_p1 = scmp.ge.s32.totalorder %s665_s16, 2  ;;  %s316_s21 = sand.u32 1, %s637_s9  }
  0xca   : > { %s317_s4 = scalar_lea.sflag [#allocation4], %s316_s21 }
  0xcb   : > { %p463_p2 = pnand %p467_p1, %p758_p12 }
  0xcd   : > { %p464_p4 = pneg %p463_p2 }
  0xcf   : > { %632 = dma.done.wait (%p464_p4), %s317_s4, 512  }
  0xd0   : > { %634 = vsyncadd (%p464_p4), %s317_s4, 4294966784  ;;  %s19_s16 = sadd.s32 1, %s665_s16   ;;  %s887_s25 = sld [smem:[#allocation8_spill]] }
  0xd1   : > { %p16_p3 = scmp.ge.s32.totalorder %s19_s16, 6   ;;  %s888_s5 = sld [smem:[#allocation9_spill]] }
  0xd2   : > { %s889_s9 = smov %s641_s10  ;;  %s890_s10 = smov %s645_s11 }
  0xd3   : > { %s891_s11 = smov %s765_s30  ;;  %s892_s12 = smov %s657_s14 }
  0xd4   : > { %s893_s13 = smov %s661_s15  ;;  %18 = sbr.rel (!%p16_p3) target bundleno = 7 (0x7), region = 81 }
  0xd6   : > { %s894_s14 = smov %s887_s25 }
  0xd7   : > { %s895_s15 = smov %s888_s5 }
  0xd9   :  { %323 = vsyncpa [#allocation3], 1 }
  0xda   :  { %325 = vsyncpa [#allocation3 + $0x1], 1 }
  0xdb   :  { %326 = vsyncpa [#allocation4], 1 }
  0xdc   :  { %328 = vsyncpa [#allocation4 + $0x1], 1 }

</bundles_post_ra>
